<compile_context>
chip_gen: v6e
topology: v6e:2x2x1
jax: 0.10.0
libtpu: 0.0.40
codegen_flags: <defaults>
</compile_context>

<pallas_src>
import jax
import jax.numpy as jnp
from jax.experimental import pallas as pl
from jax.experimental.pallas import tpu as pltpu


def _linreg_kernel(w_ref, b_ref, x_ref, o_ref):
    # w_ref, b_ref: (1, 1) f32 scalars in SMEM; x_ref / o_ref: (TM, C) VMEM tiles.
    x = x_ref[...]
    # Compute in the input dtype: exact for f32, and bf16-native on v6e/v7x
    # (halves VALU work / vreg pressure); Mosaic widens internally where the
    # VPU lacks a native path (e.g. bf16 on v5e).
    w = w_ref[0, 0].astype(x.dtype)
    b = b_ref[0, 0].astype(x.dtype)
    o_ref[...] = (w * x + b).astype(o_ref.dtype)


def _vmem_capacity_bytes() -> int:
    try:
        return int(pltpu.get_tpu_info().vmem_capacity_bytes)
    except Exception:
        return 64 << 20  # conservative fallback: v7x per-TensorCore VMEM


def _pick_tile_rows(rows: int, row_bytes: int, vmem_cap: int) -> int:
    """Byte-targeted row-tile: ~4 MiB of input per grid step, within a
    per-generation VMEM budget, with >= 4 grid steps whenever rows allow."""
    if rows <= 8:
        return rows
    # Pipeline buffers: 2 double-buffered arrays (in + out) => 4 x tile bytes.
    buf_budget = vmem_cap // 2
    max_tile_bytes = max(buf_budget // 4, row_bytes)
    target_tile_bytes = min(4 << 20, max_tile_bytes)
    tm = max(target_tile_bytes // max(row_bytes, 1), 8)
    if rows >= 32:
        # Keep at least ~4 grid steps so DMA-in / compute / DMA-out pipeline
        # (and the grid can shard across both TensorCores on v7x).
        tm = min(tm, (rows + 3) // 4)
    tm = min(tm, rows)
    if tm < rows:
        tm = max((tm // 8) * 8, 8)  # (8,128) rule when not the full dim
    return int(tm)


def linear_regression_forward(x: jax.Array, weight: jax.Array, bias: jax.Array) -> jax.Array:
    """Computes weight * x + bias elementwise (scalar weight/bias), any-rank x."""
    if not jnp.issubdtype(x.dtype, jnp.floating):
        raise TypeError(f"linear_regression_forward requires a float dtype, got {x.dtype}")

    orig_shape = x.shape
    n_total = int(x.size)
    if n_total == 0:
        return x

    # Present a lane-dense 2-D slab to the kernel. The op is elementwise /
    # layout-agnostic, so for 1-D, scalar, or ragged-last-dim inputs we flatten
    # and re-tile to a wide multiple-of-128 lane dim (padding only if needed).
    pad = 0
    if x.ndim >= 2 and x.shape[-1] >= 128 and x.shape[-1] % 128 == 0:
        x2 = x.reshape(-1, x.shape[-1])
    else:
        c = 512  # lane-dense column width (multiple of 128)
        flat = x.reshape(-1)
        padded_n = ((n_total + c - 1) // c) * c
        pad = padded_n - n_total
        if pad:
            flat = jnp.pad(flat, (0, pad))
        x2 = flat.reshape(-1, c)

    rows, d = x2.shape
    itemsize = x2.dtype.itemsize
    vmem_cap = _vmem_capacity_bytes()
    tm = _pick_tile_rows(rows, d * itemsize, vmem_cap)
    grid = (pl.cdiv(rows, tm),)

    tile_bytes = tm * d * itemsize
    vmem_limit = min(max(32 << 20, 4 * tile_bytes + (4 << 20)), vmem_cap - (8 << 20))

    w2 = weight.reshape(1, 1).astype(jnp.float32)
    b2 = bias.reshape(1, 1).astype(jnp.float32)

    cost = pl.CostEstimate(
        flops=2 * rows * d,
        transcendentals=0,
        bytes_accessed=2 * rows * d * itemsize,
    )

    out2 = pl.pallas_call(
        _linreg_kernel,
        out_shape=jax.ShapeDtypeStruct((rows, d), x2.dtype),
        grid=grid,
        in_specs=[
            pl.BlockSpec(memory_space=pltpu.SMEM),          # w (scalar)
            pl.BlockSpec(memory_space=pltpu.SMEM),          # b (scalar)
            pl.BlockSpec((tm, d), lambda i: (i, 0)),        # x tile (lane-dense)
        ],
        out_specs=pl.BlockSpec((tm, d), lambda i: (i, 0)),
        compiler_params=pltpu.CompilerParams(
            dimension_semantics=("parallel",),
            vmem_limit_bytes=int(vmem_limit),
        ),
        cost_estimate=cost,
    )(w2, b2, x2)

    if pad:
        return out2.reshape(-1)[:n_total].reshape(orig_shape)
    return out2.reshape(orig_shape)


if __name__ == "__main__":
    key = jax.random.PRNGKey(0)
    k_w, k_b, k_x = jax.random.split(key, 3)

    # Deterministic parameter init (torch.randn(1) analogues).
    weight = jax.random.normal(k_w, (1,), dtype=jnp.float32)
    bias = jax.random.normal(k_b, (1,), dtype=jnp.float32)

    # Multi-tile 2-D example input: lane-dense D, several pipelined grid steps.
    x = jax.random.normal(k_x, (2048, 256), dtype=jnp.float32)
    y = jax.block_until_ready(linear_regression_forward(x, weight, bias))
    y_ref = weight[0] * x + bias[0]
    assert y.shape == x.shape and y.dtype == x.dtype
    assert jnp.allclose(y, y_ref, atol=1e-6), "mismatch vs reference (2-D)"

    # Also exercise the 1-D (ragged length) re-tiling / padding path.
    x1 = jax.random.normal(k_x, (1000,), dtype=jnp.float32)
    y1 = jax.block_until_ready(linear_regression_forward(x1, weight, bias))
    assert y1.shape == x1.shape and y1.dtype == x1.dtype
    assert jnp.allclose(y1, weight[0] * x1 + bias[0], atol=1e-6), "mismatch vs reference (1-D)"

    print("KERNEL_OK")
</pallas_src>

<mosaic_0001>
module attributes {stable_mosaic.version = 11 : i64} {
  func.func @_linreg_kernel(%arg0: i32, %arg1: memref<1x1xf32, #tpu.memory_space<smem>>, %arg2: memref<1x1xf32, #tpu.memory_space<smem>>, %arg3: memref<512x256xf32, #tpu.memory_space<vmem>>, %arg4: memref<512x256xf32, #tpu.memory_space<vmem>>) attributes {dimension_semantics = [#tpu.dimension_semantics<parallel>], iteration_bounds = array<i64: 4>, scalar_prefetch = 0 : i64, scratch_operands = 0 : i64, tpu.core_type = #tpu.core_type<tc>, window_params = [{transform_indices = @transform_0, window_bounds = array<i64: 1, 1>}, {transform_indices = @transform_1, window_bounds = array<i64: 1, 1>}, {transform_indices = @transform_2, window_bounds = array<i64: 512, 256>}, {transform_indices = @transform_3, window_bounds = array<i64: 512, 256>}]} {
    %c0 = arith.constant 0 : index
    %c0_0 = arith.constant 0 : index
    %0 = vector.load %arg3[%c0, %c0_0] : memref<512x256xf32, #tpu.memory_space<vmem>>, vector<512x256xf32>
    %c0_1 = arith.constant 0 : index
    %c0_2 = arith.constant 0 : index
    %1 = memref.load %arg1[%c0_1, %c0_2] : memref<1x1xf32, #tpu.memory_space<smem>>
    %c0_3 = arith.constant 0 : index
    %c0_4 = arith.constant 0 : index
    %2 = memref.load %arg2[%c0_3, %c0_4] : memref<1x1xf32, #tpu.memory_space<smem>>
    %3 = vector.broadcast %1 : f32 to vector<512x256xf32>
    %4 = arith.mulf %3, %0 : vector<512x256xf32>
    %5 = vector.broadcast %2 : f32 to vector<512x256xf32>
    %6 = arith.addf %4, %5 : vector<512x256xf32>
    %c0_5 = arith.constant 0 : index
    %c0_6 = arith.constant 0 : index
    %7 = vector.load %arg4[%c0_5, %c0_6] : memref<512x256xf32, #tpu.memory_space<vmem>>, vector<512x256xf32>
    tpu.vector_store %arg4[%c0_5, %c0_6], %6 {strides = array<i32>} : memref<512x256xf32, #tpu.memory_space<vmem>>, vector<512x256xf32>,
    return
  }
  func.func @transform_0(%arg0: i32) -> (i32, i32) {
    %c0_i32 = arith.constant 0 : i32
    %c0_i32_0 = arith.constant 0 : i32
    %c0_i32_1 = arith.constant 0 : i32
    return %c0_i32, %c0_i32_0 : i32, i32
  }
  func.func @transform_1(%arg0: i32) -> (i32, i32) {
    %c0_i32 = arith.constant 0 : i32
    %c0_i32_0 = arith.constant 0 : i32
    %c0_i32_1 = arith.constant 0 : i32
    return %c0_i32, %c0_i32_0 : i32, i32
  }
  func.func @transform_2(%arg0: i32) -> (i32, i32) {
    %c0_i32 = arith.constant 0 : i32
    %c0_i32_0 = arith.constant 0 : i32
    return %arg0, %c0_i32 : i32, i32
  }
  func.func @transform_3(%arg0: i32) -> (i32, i32) {
    %c0_i32 = arith.constant 0 : i32
    %c0_i32_0 = arith.constant 0 : i32
    return %arg0, %c0_i32 : i32, i32
  }
}

</mosaic_0001>

<bundles_post_ra>
// kernel: tpu_custom_call.1
= control target key start
LH: loop header
LB: loop body
LE: loop exit
PB: predicated region body
PF: predicated region fallthrough
CT: control target
= control target key end

     0   :  { %s1671_s0 = inlined_call_operand.<no memory space> [shape: f32[1,1], index: 0, kind: input, shape index: {}]   ;;  %s1672_s1 = inlined_call_operand.<no memory space> [shape: f32[1,1], index: 1, kind: input, shape index: {}]   ;;  %s1673_s2 = inlined_call_operand.hbm [shape: f32[2048,256], index: 2, kind: input, shape index: {}]   ;;  %s1674_s3 = inlined_call_operand.hbm [shape: f32[2048,256], index: 3, kind: output, shape index: {}]  }
   0x1   :  { %8 = sst [smem:[#allocation2]] %s1671_s0 }
   0x2   :  { %9 = sst [smem:[#allocation3]] %s1672_s1 }
   0x3   :  { %10 = vsyncpa [#allocation5], 0 }
   0x4   :  { %12 = vsyncpa [#allocation5 + $0x1], 0 }
   0x5   :  { %13 = vsyncpa [#allocation6], 0 }
   0x6   :  { %15 = vsyncpa [#allocation6 + $0x1], 0  ;;  %s994_s16 = smov 0   ;;  %s996_s17 = smov 0  }
   0x7   :  { %s998_s18 = smov 0   ;;  %s1000_s19 = smov 0  }
   0x8 LB: > { %s1015_s0 = sadd.s32 4294967295, %s960_s19   ;;  %s798_s1 = sadd.s32 4294967294, %s960_s19   ;;  %s960_s19 = sphi %s1000_s19, %s1688_s19   ;;  %s956_s18 = sphi %s998_s18, %s1687_s18   ;;  %s952_s17 = sphi %s996_s17, %s1686_s17   ;;  %s948_s16 = sphi %s994_s16, %s1685_s16  }
   0x9   : > { %s1019_s20 = sadd.s32 1, %s960_s19   ;;  %s70_s21 = sadd.s32 1, %s956_s18 }
   0xa   : > { %s67_s22 = ssub.s32 %s960_s19, %s1019_s20  ;;  %p77_p0 = scmp.ne.s32.totalorder %s956_s18, %s952_s17 }
   0xb   : > { %p68_p1 = scmp.eq.s32.totalorder %s67_s22, 0  ;;  %p78_p2 = scmp.eq.s32.totalorder %s960_s19, 0 }
   0xc   : > { %p83_p3 = scmp.ne.s32.totalorder %s952_s17, %s948_s16  ;;  %p84_p4 = scmp.eq.s32.totalorder %s1015_s0, 0 }
   0xd   : > { %s1031_s23 = scalar_select %p68_p1, %s956_s18, %s70_s21  }
   0xe   : > { %p1033_p5 = por %p78_p2, %p77_p0  ;;  %p1037_p6 = por %p84_p4, %p83_p3 }
   0xf   : > { %p107_p7 = scmp.eq.s32.totalorder %s1015_s0, 3  ;;  %p113_p8 = scmp.eq.s32.totalorder %s798_s1, 3 }
  0x10   : > { %s1678_s25 = scalar_select %p1037_p6, 1, 0 }
  0x11   : > { %p830_p9 = scmp.lt.s32.totalorder %s960_s19, 4  ;;  %p1043_p10 = por %p107_p7, %p77_p0 }
  0x12   : > { %p1047_p11 = por %p113_p8, %p83_p3  ;;  %s139_s28 = sand.u32 1, %s956_s18  }
  0x13   : > { %s1679_s26 = scalar_select %p1043_p10, 1, 0 }
  0x14   : > { %s1680_s27 = scalar_select %p1047_p11, 1, 0 }
  0x15   : > { %s815_s29 = sshll.u32 %s960_s19, 14  ;;  %s801_s30 = sshll.u32 %s139_s28, 10 }
  0x16   : > { %s1056_s6 = scalar_lea.hbm %s1673_s2, %s815_s29  ;;  %s143_s7 = scalar_lea.vmem [#allocation4], %s801_s30 }
  0x17   : > { %s151_s8 = sshll.u32 %s143_s7, 4  ;;  %p1060_p12 = pnand %p830_p9, %p1033_p5  ;;  %s1064_s8 = int_to_ptr.vmem [resolvable:$true] %s151_s8 }
  0x18   : > { %s1066_s10 = scalar_lea.sflag [#allocation5], %s139_s28  ;;  %s868_s11 = scalar_lea.hbm %s1056_s6, 16384 }
  0x19   : > { %p869_p13 = scmp.ne.s32.totalorder %s1056_s6, %s868_s11  ;;  %p870_p0 = pneg %p1060_p12 }
  0x1a   : > { %s873_s14 = scalar_lea.hbm %s1673_s2, 65536  ;;  %p874_p3 = scmp.lt.s32.totalorder %s1056_s6, %s1673_s2 }
  0x1b   : > { %p871_p1 = pnand %p870_p0, %p869_p13  ;;  %p875_p4 = scmp.lt.s32.totalorder %s873_s14, %s868_s11 }
  0x1d   : > { %p872_p2 = pneg %p871_p1  ;;  %p876_p5 = por %p875_p4, %p874_p3 }
  0x1f   : > { %p877_p7 = pnand %p876_p5, %p872_p2 }
  0x21   : > { %880 = shalt.err (!%p877_p7)
}
  0x22   : > { %s881_s21 = scalar_lea.vmem %s1064_s8, 16384  ;;  %s962_s22 = smov [#allocation4]  }
  0x23   : > { %p882_p8 = scmp.ne.s32.totalorder %s1064_s8, %s881_s21  ;;  %s886_s24 = sshll.u32 %s962_s22, 4  ;;  %s887_s24 = int_to_ptr.vmem [resolvable:$false] %s886_s24 }
  0x24   : > { %s888_s28 = scalar_lea.vmem %s887_s24, 32768  ;;  %p889_p1 = scmp.lt.s32.totalorder %s1064_s8, %s887_s24 }
  0x25   : > { %p884_p9 = pnand %p882_p8, %p870_p0  ;;  %p890_p11 = scmp.lt.s32.totalorder %s888_s28, %s881_s21 }
  0x27   : > { %p885_p13 = pneg %p884_p9  ;;  %p891_p10 = por %p890_p11, %p889_p1 }
  0x29   : > { %p892_p6 = pnand %p891_p10, %p885_p13 }
  0x2b   : > { %895 = shalt.err (!%p892_p6)
}
  0x2c   : > { %s963_s29 = smov 256   ;;  %s964_s30 = smov 16  }
  0x2d   : > { %825 = dma.hbm_to_vmem [thread:$0]  (!%p1060_p12), %s1056_s6, 16384, %s1064_s8, %s1066_s10, %s963_s29, %s963_s29, %s964_s30  }
  0x2e   : > { %p805_p0 = scmp.ge.s32.totalorder %s960_s19, 1  ;;  %p159_p2 = scmp.lt.s32.totalorder %s960_s19, 5 }
  0x30   : > { %p160_p3 = pnand %p805_p0, %p159_p2 }
  0x31   : > { %s1090_s4 = sand.u32 (!%p160_p3), 1, %s952_s17   ;;  %p1682_p6 = scmp.ne.s32.totalorder (!%p160_p3), %s1678_s25, 0 }
  0x32   : > { %163 = sbr.rel (%p160_p3) target bundleno = 156 (0x9c), region = 32  ;;  %s806_s5 = sshll.u32 (!%p160_p3), %s1090_s4, 10 }
  0x33   : > { %s166_s7 = scalar_lea.sflag (!%p160_p3), [#allocation5], %s1090_s4  ;;  %s1096_s11 = scalar_lea.vmem (!%p160_p3), [#allocation4], %s806_s5 }
  0x37   : > { %939 = dma.done.wait (%p1682_p6), %s166_s7, 16384  }
  0x38   : > { %941 = vsyncadd (%p1682_p6), %s166_s7, 4294950912  ;;  %s322_s6 = sld [smem:[#allocation2]]  ;;  %v194_v0 = vld [vmem:[%s1096_s11] sm:$0xff]  ;;  %v195_v2 = vld [vmem:[%s1096_s11 + $0x8] sm:$0xff]  ;;  %s1137_s25 = scalar_lea.vmem [#allocation7], %s806_s5 }
  0x39   : > { %s323_s8 = sld [smem:[#allocation3]]  ;;  %v196_v3 = vld [vmem:[%s1096_s11 + $0x10] sm:$0xff]  ;;  %v197_v8 = vld [vmem:[%s1096_s11 + $0x18] sm:$0xff]  ;;  %v198_v9 = vld [vmem:[%s1096_s11 + $0x20] sm:$0xff]  ;;  %s817_s9 = sshll.u32 %s1015_s0, 14 }
  0x3a   : > { %v199_v10 = vld [vmem:[%s1096_s11 + $0x28] sm:$0xff]  ;;  %v200_v14 = vld [vmem:[%s1096_s11 + $0x30] sm:$0xff]  ;;  %v201_v15 = vld [vmem:[%s1096_s11 + $0x38] sm:$0xff]  ;;  %s725_s10 = sshll.u32 %s1137_s25, 4  ;;  %s1621_s13 = scalar_lea.hbm %s1674_s3, %s817_s9  ;;  %s1627_s10 = int_to_ptr.vmem [resolvable:$true] %s725_s10 }
  0x3b   : > { %v202_v16 = vld [vmem:[%s1096_s11 + $0x40] sm:$0xff]  ;;  %v203_v21 = vld [vmem:[%s1096_s11 + $0x48] sm:$0xff]  ;;  %v204_v22 = vld [vmem:[%s1096_s11 + $0x50] sm:$0xff]  ;;  %s711_s14 = scalar_lea.sflag [#allocation6], %s1090_s4  ;;  %s896_s15 = scalar_lea.vmem %s1627_s10, 16384 }
  0x3c   : > { %v205_v23 = vld [vmem:[%s1096_s11 + $0x58] sm:$0xff]  ;;  %v206_v28 = vld [vmem:[%s1096_s11 + $0x60] sm:$0xff]  ;;  %v207_v29 = vld [vmem:[%s1096_s11 + $0x68] sm:$0xff]  ;;  %p897_p10 = scmp.ne.s32.totalorder %s1627_s10, %s896_s15  ;;  %p1683_p11 = scmp.ne.s32.totalorder %s1679_s26, 0 }
  0x3d   : > { %v208_v30 = vld [vmem:[%s1096_s11 + $0x70] sm:$0xff]  ;;  %v209_v35 = vld [vmem:[%s1096_s11 + $0x78] sm:$0xff]  ;;  %v210_v40 = vld [vmem:[%s1096_s11 + $0x80] sm:$0xff]  ;;  %s965_s1 = smov [#allocation7]  }
  0x3e   : > { %v1103_v1 = vstv %s322_s6  ;;  %v211_v41 = vld [vmem:[%s1096_s11 + $0x88] sm:$0xff]  ;;  %v212_v42 = vld [vmem:[%s1096_s11 + $0x90] sm:$0xff]  ;;  %v213_v47 = vld [vmem:[%s1096_s11 + $0x98] sm:$0xff]  ;;  %p898_p12 = pnand %p897_p10, %p1683_p11  ;;  %s900_s21 = sshll.u32 %s965_s1, 4  ;;  %s901_s21 = int_to_ptr.vmem [resolvable:$false] %s900_s21 }
  0x3f   : > { %v325_v4 = vmul.f32 %v1103_v1, %v194_v0  ;;  %v1108_v5 = vstv %s323_s8  ;;  %v326_v6 = vmul.f32 %v1103_v1, %v195_v2  ;;  %v327_v7 = vmul.f32 %v1103_v1, %v196_v3  ;;  %v214_v48 = vld [vmem:[%s1096_s11 + $0xa0] sm:$0xff]  ;;  %v215_v49 = vld [vmem:[%s1096_s11 + $0xa8] sm:$0xff]  ;;  %v216_v54 = vld [vmem:[%s1096_s11 + $0xb0] sm:$0xff]  ;;  %s902_s22 = scalar_lea.vmem %s901_s21, 32768  ;;  %p903_p5 = scmp.lt.s32.totalorder %s1627_s10, %s901_s21 }
  0x40   : > { %v328_v11 = vmul.f32 %v1103_v1, %v197_v8  ;;  %v329_v12 = vmul.f32 %v1103_v1, %v198_v9  ;;  %v330_v13 = vmul.f32 %v1103_v1, %v199_v10  ;;  %v331_v20 = vmul.f32 %v1103_v1, %v200_v14  ;;  %v217_v59 = vld [vmem:[%s1096_s11 + $0xb8] sm:$0xff]  ;;  %v218_v0 = vld [vmem:[%s1096_s11 + $0xc0] sm:$0xff]  ;;  %v219_v2 = vld [vmem:[%s1096_s11 + $0xc8] sm:$0xff]  ;;  %p899_p4 = pneg %p898_p12  ;;  %p904_p7 = scmp.lt.s32.totalorder %s902_s22, %s896_s15 }
  0x41   : > { %v454_v17 = vadd.f32 %v1108_v5, %v325_v4  ;;  %v455_v18 = vadd.f32 %v1108_v5, %v326_v6  ;;  %v456_v19 = vadd.f32 %v1108_v5, %v327_v7  ;;  %v332_v27 = vmul.f32 %v1103_v1, %v201_v15  ;;  %v220_v3 = vld [vmem:[%s1096_s11 + $0xd0] sm:$0xff]  ;;  %v221_v9 = vld [vmem:[%s1096_s11 + $0xd8] sm:$0xff]  ;;  %v222_v10 = vld [vmem:[%s1096_s11 + $0xe0] sm:$0xff] }
  0x42   : > { %v457_v24 = vadd.f32 %v1108_v5, %v328_v11  ;;  %v458_v25 = vadd.f32 %v1108_v5, %v329_v12  ;;  %v459_v26 = vadd.f32 %v1108_v5, %v330_v13  ;;  %v460_v31 = vadd.f32 %v1108_v5, %v331_v20  ;;  %v223_v11 = vld [vmem:[%s1096_s11 + $0xe8] sm:$0xff]  ;;  %p905_p8 = por %p904_p7, %p903_p5 }
  0x43   : > { %582 = vst [vmem:[%s1137_s25] sm:$0xff] %v454_v17  ;;  %583 = vst [vmem:[%s1137_s25 + $0x8] sm:$0xff] %v455_v18  ;;  %v333_v32 = vmul.f32 %v1103_v1, %v202_v16  ;;  %v334_v33 = vmul.f32 %v1103_v1, %v203_v21  ;;  %v335_v34 = vmul.f32 %v1103_v1, %v204_v22  ;;  %v224_v16 = vld [vmem:[%s1096_s11 + $0xf0] sm:$0xff]  ;;  %v225_v21 = vld [vmem:[%s1096_s11 + $0xf8] sm:$0xff] }
  0x44   : > { %584 = vst [vmem:[%s1137_s25 + $0x10] sm:$0xff] %v456_v19  ;;  %585 = vst [vmem:[%s1137_s25 + $0x18] sm:$0xff] %v457_v24  ;;  %v461_v36 = vadd.f32 %v1108_v5, %v332_v27  ;;  %v336_v37 = vmul.f32 %v1103_v1, %v205_v23  ;;  %v337_v38 = vmul.f32 %v1103_v1, %v206_v28  ;;  %v227_v27 = vld [vmem:[%s1096_s11 + $0x108] sm:$0xff]  ;;  %v228_v28 = vld [vmem:[%s1096_s11 + $0x110] sm:$0xff]  ;;  %p906_p9 = pnand %p905_p8, %p899_p4 }
  0x45   : > { %586 = vst [vmem:[%s1137_s25 + $0x20] sm:$0xff] %v458_v25  ;;  %587 = vst [vmem:[%s1137_s25 + $0x28] sm:$0xff] %v459_v26  ;;  %v338_v39 = vmul.f32 %v1103_v1, %v207_v29  ;;  %v462_v43 = vadd.f32 %v1108_v5, %v333_v32  ;;  %v463_v44 = vadd.f32 %v1108_v5, %v334_v33  ;;  %v226_v26 = vld [vmem:[%s1096_s11 + $0x100] sm:$0xff]  ;;  %v229_v33 = vld [vmem:[%s1096_s11 + $0x118] sm:$0xff] }
  0x46   : > { %588 = vst [vmem:[%s1137_s25 + $0x30] sm:$0xff] %v460_v31  ;;  %v464_v45 = vadd.f32 %v1108_v5, %v335_v34  ;;  %v339_v46 = vmul.f32 %v1103_v1, %v208_v30  ;;  %589 = vst [vmem:[%s1137_s25 + $0x38] sm:$0xff] %v461_v36  ;;  %v465_v50 = vadd.f32 %v1108_v5, %v336_v37  ;;  %v230_v34 = vld [vmem:[%s1096_s11 + $0x120] sm:$0xff] }
  0x47   : > { %v466_v51 = vadd.f32 %v1108_v5, %v337_v38  ;;  %v467_v52 = vadd.f32 %v1108_v5, %v338_v39  ;;  %v340_v53 = vmul.f32 %v1103_v1, %v209_v35  ;;  %590 = vst [vmem:[%s1137_s25 + $0x40] sm:$0xff] %v462_v43  ;;  %591 = vst [vmem:[%s1137_s25 + $0x48] sm:$0xff] %v463_v44  ;;  %v231_v35 = vld [vmem:[%s1096_s11 + $0x128] sm:$0xff] }
  0x48   : > { %592 = vst [vmem:[%s1137_s25 + $0x50] sm:$0xff] %v464_v45  ;;  %v468_v55 = vadd.f32 %v1108_v5, %v339_v46  ;;  %v341_v56 = vmul.f32 %v1103_v1, %v210_v40  ;;  %v342_v57 = vmul.f32 %v1103_v1, %v211_v41  ;;  %v343_v58 = vmul.f32 %v1103_v1, %v212_v42  ;;  %v232_v40 = vld [vmem:[%s1096_s11 + $0x130] sm:$0xff]  ;;  %v233_v45 = vld [vmem:[%s1096_s11 + $0x138] sm:$0xff] }
  0x49   : > { %593 = vst [vmem:[%s1137_s25 + $0x58] sm:$0xff] %v465_v50  ;;  %594 = vst [vmem:[%s1137_s25 + $0x60] sm:$0xff] %v466_v51  ;;  %v469_v60 = vadd.f32 %v1108_v5, %v340_v53  ;;  %v344_v61 = vmul.f32 %v1103_v1, %v213_v47  ;;  %v345_v62 = vmul.f32 %v1103_v1, %v214_v48  ;;  %v234_v50 = vld [vmem:[%s1096_s11 + $0x140] sm:$0xff]  ;;  %v235_v51 = vld [vmem:[%s1096_s11 + $0x148] sm:$0xff] }
  0x4a   : > { %595 = vst [vmem:[%s1137_s25 + $0x68] sm:$0xff] %v467_v52  ;;  %v346_v63 = vmul.f32 %v1103_v1, %v215_v49  ;;  %596 = vst [vmem:[%s1137_s25 + $0x70] sm:$0xff] %v468_v55  ;;  %v470_v4 = vadd.f32 %v1108_v5, %v341_v56  ;;  %v471_v6 = vadd.f32 %v1108_v5, %v342_v57  ;;  %v236_v52 = vld [vmem:[%s1096_s11 + $0x150] sm:$0xff]  ;;  %v237_v57 = vld [vmem:[%s1096_s11 + $0x158] sm:$0xff] }
  0x4b   : > { %v472_v7 = vadd.f32 %v1108_v5, %v343_v58  ;;  %v347_v8 = vmul.f32 %v1103_v1, %v216_v54  ;;  %597 = vst [vmem:[%s1137_s25 + $0x78] sm:$0xff] %v469_v60  ;;  %v473_v12 = vadd.f32 %v1108_v5, %v344_v61  ;;  %v474_v13 = vadd.f32 %v1108_v5, %v345_v62  ;;  %v238_v58 = vld [vmem:[%s1096_s11 + $0x160] sm:$0xff] }
  0x4c   : > { %v475_v14 = vadd.f32 %v1108_v5, %v346_v63  ;;  %v348_v15 = vmul.f32 %v1103_v1, %v217_v59  ;;  %598 = vst [vmem:[%s1137_s25 + $0x80] sm:$0xff] %v470_v4  ;;  %599 = vst [vmem:[%s1137_s25 + $0x88] sm:$0xff] %v471_v6  ;;  %v349_v18 = vmul.f32 %v1103_v1, %v218_v0  ;;  %v239_v59 = vld [vmem:[%s1096_s11 + $0x168] sm:$0xff]  ;;  %v240_v0 = vld [vmem:[%s1096_s11 + $0x170] sm:$0xff] }
  0x4d   : > { %600 = vst [vmem:[%s1137_s25 + $0x90] sm:$0xff] %v472_v7  ;;  %v476_v17 = vadd.f32 %v1108_v5, %v347_v8  ;;  %v350_v19 = vmul.f32 %v1103_v1, %v219_v2  ;;  %v351_v20 = vmul.f32 %v1103_v1, %v220_v3  ;;  %601 = vst [vmem:[%s1137_s25 + $0x98] sm:$0xff] %v473_v12  ;;  %v241_v7 = vld [vmem:[%s1096_s11 + $0x178] sm:$0xff]  ;;  %v242_v12 = vld [vmem:[%s1096_s11 + $0x180] sm:$0xff] }
  0x4e   : > { %602 = vst [vmem:[%s1137_s25 + $0xa0] sm:$0xff] %v474_v13  ;;  %603 = vst [vmem:[%s1137_s25 + $0xa8] sm:$0xff] %v475_v14  ;;  %v477_v22 = vadd.f32 %v1108_v5, %v348_v15  ;;  %v352_v23 = vmul.f32 %v1103_v1, %v221_v9  ;;  %v353_v24 = vmul.f32 %v1103_v1, %v222_v10  ;;  %v243_v13 = vld [vmem:[%s1096_s11 + $0x188] sm:$0xff]  ;;  %v244_v14 = vld [vmem:[%s1096_s11 + $0x190] sm:$0xff] }
  0x4f   : > { %v354_v25 = vmul.f32 %v1103_v1, %v223_v11  ;;  %604 = vst [vmem:[%s1137_s25 + $0xb0] sm:$0xff] %v476_v17  ;;  %v478_v29 = vadd.f32 %v1108_v5, %v349_v18  ;;  %v479_v30 = vadd.f32 %v1108_v5, %v350_v19  ;;  %v480_v31 = vadd.f32 %v1108_v5, %v351_v20  ;;  %v245_v19 = vld [vmem:[%s1096_s11 + $0x198] sm:$0xff]  ;;  %v246_v20 = vld [vmem:[%s1096_s11 + $0x1a0] sm:$0xff] }
  0x50   : > { %v355_v32 = vmul.f32 %v1103_v1, %v224_v16  ;;  %605 = vst [vmem:[%s1137_s25 + $0xb8] sm:$0xff] %v477_v22  ;;  %v481_v36 = vadd.f32 %v1108_v5, %v352_v23  ;;  %v482_v37 = vadd.f32 %v1108_v5, %v353_v24  ;;  %v356_v39 = vmul.f32 %v1103_v1, %v225_v21  ;;  %v247_v21 = vld [vmem:[%s1096_s11 + $0x1a8] sm:$0xff] }
  0x51   : > { %v483_v38 = vadd.f32 %v1108_v5, %v354_v25  ;;  %606 = vst [vmem:[%s1137_s25 + $0xc0] sm:$0xff] %v478_v29  ;;  %607 = vst [vmem:[%s1137_s25 + $0xc8] sm:$0xff] %v479_v30  ;;  %v357_v42 = vmul.f32 %v1103_v1, %v226_v26  ;;  %v358_v43 = vmul.f32 %v1103_v1, %v227_v27  ;;  %v248_v26 = vld [vmem:[%s1096_s11 + $0x1b0] sm:$0xff] }
  0x52   : > { %608 = vst [vmem:[%s1137_s25 + $0xd0] sm:$0xff] %v480_v31  ;;  %v484_v41 = vadd.f32 %v1108_v5, %v355_v32  ;;  %v359_v44 = vmul.f32 %v1103_v1, %v228_v28  ;;  %609 = vst [vmem:[%s1137_s25 + $0xd8] sm:$0xff] %v481_v36  ;;  %v485_v46 = vadd.f32 %v1108_v5, %v356_v39  ;;  %v249_v31 = vld [vmem:[%s1096_s11 + $0x1b8] sm:$0xff]  ;;  %v250_v36 = vld [vmem:[%s1096_s11 + $0x1c0] sm:$0xff] }
  0x53   : > { %610 = vst [vmem:[%s1137_s25 + $0xe0] sm:$0xff] %v482_v37  ;;  %611 = vst [vmem:[%s1137_s25 + $0xe8] sm:$0xff] %v483_v38  ;;  %v360_v47 = vmul.f32 %v1103_v1, %v229_v33  ;;  %v361_v48 = vmul.f32 %v1103_v1, %v230_v34  ;;  %v362_v49 = vmul.f32 %v1103_v1, %v231_v35  ;;  %v251_v37 = vld [vmem:[%s1096_s11 + $0x1c8] sm:$0xff]  ;;  %v252_v38 = vld [vmem:[%s1096_s11 + $0x1d0] sm:$0xff] }
  0x54   : > { %612 = vst [vmem:[%s1137_s25 + $0xf0] sm:$0xff] %v484_v41  ;;  %v486_v53 = vadd.f32 %v1108_v5, %v357_v42  ;;  %v487_v54 = vadd.f32 %v1108_v5, %v358_v43  ;;  %v488_v55 = vadd.f32 %v1108_v5, %v359_v44  ;;  %v363_v56 = vmul.f32 %v1103_v1, %v232_v40  ;;  %v253_v43 = vld [vmem:[%s1096_s11 + $0x1d8] sm:$0xff]  ;;  %v254_v44 = vld [vmem:[%s1096_s11 + $0x1e0] sm:$0xff] }
  0x55   : > { %613 = vst [vmem:[%s1137_s25 + $0xf8] sm:$0xff] %v485_v46  ;;  %v489_v60 = vadd.f32 %v1108_v5, %v360_v47  ;;  %v490_v61 = vadd.f32 %v1108_v5, %v361_v48  ;;  %v491_v62 = vadd.f32 %v1108_v5, %v362_v49  ;;  %v364_v63 = vmul.f32 %v1103_v1, %v233_v45  ;;  %v255_v45 = vld [vmem:[%s1096_s11 + $0x1e8] sm:$0xff] }
  0x56   : > { %614 = vst [vmem:[%s1137_s25 + $0x100] sm:$0xff] %v486_v53  ;;  %615 = vst [vmem:[%s1137_s25 + $0x108] sm:$0xff] %v487_v54  ;;  %v492_v2 = vadd.f32 %v1108_v5, %v363_v56  ;;  %v365_v3 = vmul.f32 %v1103_v1, %v234_v50  ;;  %v366_v4 = vmul.f32 %v1103_v1, %v235_v51  ;;  %v256_v50 = vld [vmem:[%s1096_s11 + $0x1f0] sm:$0xff] }
  0x57   : > { %616 = vst [vmem:[%s1137_s25 + $0x110] sm:$0xff] %v488_v55  ;;  %v367_v6 = vmul.f32 %v1103_v1, %v236_v52  ;;  %617 = vst [vmem:[%s1137_s25 + $0x118] sm:$0xff] %v489_v60  ;;  %v493_v8 = vadd.f32 %v1108_v5, %v364_v63  ;;  %v368_v9 = vmul.f32 %v1103_v1, %v237_v57  ;;  %v257_v55 = vld [vmem:[%s1096_s11 + $0x1f8] sm:$0xff]  ;;  %v258_v60 = vld [vmem:[%s1096_s11 + $0x200] sm:$0xff] }
  0x58   : > { %618 = vst [vmem:[%s1137_s25 + $0x120] sm:$0xff] %v490_v61  ;;  %619 = vst [vmem:[%s1137_s25 + $0x128] sm:$0xff] %v491_v62  ;;  %v369_v10 = vmul.f32 %v1103_v1, %v238_v58  ;;  %v370_v11 = vmul.f32 %v1103_v1, %v239_v59  ;;  %v494_v15 = vadd.f32 %v1108_v5, %v365_v3  ;;  %v259_v61 = vld [vmem:[%s1096_s11 + $0x208] sm:$0xff]  ;;  %v260_v62 = vld [vmem:[%s1096_s11 + $0x210] sm:$0xff] }
  0x59   : > { %620 = vst [vmem:[%s1137_s25 + $0x130] sm:$0xff] %v492_v2  ;;  %v495_v16 = vadd.f32 %v1108_v5, %v366_v4  ;;  %v496_v17 = vadd.f32 %v1108_v5, %v367_v6  ;;  %v371_v18 = vmul.f32 %v1103_v1, %v240_v0  ;;  %621 = vst [vmem:[%s1137_s25 + $0x138] sm:$0xff] %v493_v8  ;;  %v261_v4 = vld [vmem:[%s1096_s11 + $0x218] sm:$0xff]  ;;  %v262_v6 = vld [vmem:[%s1096_s11 + $0x220] sm:$0xff] }
  0x5a   : > { %v497_v22 = vadd.f32 %v1108_v5, %v368_v9  ;;  %v498_v23 = vadd.f32 %v1108_v5, %v369_v10  ;;  %v499_v24 = vadd.f32 %v1108_v5, %v370_v11  ;;  %v372_v25 = vmul.f32 %v1103_v1, %v241_v7  ;;  %622 = vst [vmem:[%s1137_s25 + $0x140] sm:$0xff] %v494_v15  ;;  %v263_v7 = vld [vmem:[%s1096_s11 + $0x228] sm:$0xff] }
  0x5b   : > { %623 = vst [vmem:[%s1137_s25 + $0x148] sm:$0xff] %v495_v16  ;;  %624 = vst [vmem:[%s1137_s25 + $0x150] sm:$0xff] %v496_v17  ;;  %v500_v27 = vadd.f32 %v1108_v5, %v371_v18  ;;  %v373_v28 = vmul.f32 %v1103_v1, %v242_v12  ;;  %v374_v29 = vmul.f32 %v1103_v1, %v243_v13  ;;  %v264_v12 = vld [vmem:[%s1096_s11 + $0x230] sm:$0xff]  ;;  %v265_v17 = vld [vmem:[%s1096_s11 + $0x238] sm:$0xff] }
  0x5c   : > { %v375_v30 = vmul.f32 %v1103_v1, %v244_v14  ;;  %625 = vst [vmem:[%s1137_s25 + $0x158] sm:$0xff] %v497_v22  ;;  %626 = vst [vmem:[%s1137_s25 + $0x160] sm:$0xff] %v498_v23  ;;  %v501_v32 = vadd.f32 %v1108_v5, %v372_v25  ;;  %v376_v33 = vmul.f32 %v1103_v1, %v245_v19  ;;  %v266_v22 = vld [vmem:[%s1096_s11 + $0x240] sm:$0xff]  ;;  %v267_v23 = vld [vmem:[%s1096_s11 + $0x248] sm:$0xff] }
  0x5d   : > { %627 = vst [vmem:[%s1137_s25 + $0x168] sm:$0xff] %v499_v24  ;;  %v377_v34 = vmul.f32 %v1103_v1, %v246_v20  ;;  %v378_v35 = vmul.f32 %v1103_v1, %v247_v21  ;;  %628 = vst [vmem:[%s1137_s25 + $0x170] sm:$0xff] %v500_v27  ;;  %v502_v39 = vadd.f32 %v1108_v5, %v373_v28  ;;  %v268_v24 = vld [vmem:[%s1096_s11 + $0x250] sm:$0xff] }
  0x5e   : > { %v503_v40 = vadd.f32 %v1108_v5, %v374_v29  ;;  %v504_v41 = vadd.f32 %v1108_v5, %v375_v30  ;;  %v379_v42 = vmul.f32 %v1103_v1, %v248_v26  ;;  %629 = vst [vmem:[%s1137_s25 + $0x178] sm:$0xff] %v501_v32  ;;  %v505_v46 = vadd.f32 %v1108_v5, %v376_v33  ;;  %v269_v29 = vld [vmem:[%s1096_s11 + $0x258] sm:$0xff]  ;;  %v270_v30 = vld [vmem:[%s1096_s11 + $0x260] sm:$0xff] }
  0x5f   : > { %v506_v47 = vadd.f32 %v1108_v5, %v377_v34  ;;  %v507_v48 = vadd.f32 %v1108_v5, %v378_v35  ;;  %v380_v49 = vmul.f32 %v1103_v1, %v249_v31  ;;  %630 = vst [vmem:[%s1137_s25 + $0x180] sm:$0xff] %v502_v39  ;;  %v381_v52 = vmul.f32 %v1103_v1, %v250_v36  ;;  %v271_v31 = vld [vmem:[%s1096_s11 + $0x268] sm:$0xff]  ;;  %v272_v36 = vld [vmem:[%s1096_s11 + $0x270] sm:$0xff] }
  0x60   : > { %631 = vst [vmem:[%s1137_s25 + $0x188] sm:$0xff] %v503_v40  ;;  %632 = vst [vmem:[%s1137_s25 + $0x190] sm:$0xff] %v504_v41  ;;  %v508_v51 = vadd.f32 %v1108_v5, %v379_v42  ;;  %v382_v53 = vmul.f32 %v1103_v1, %v251_v37  ;;  %v383_v54 = vmul.f32 %v1103_v1, %v252_v38  ;;  %v273_v41 = vld [vmem:[%s1096_s11 + $0x278] sm:$0xff] }
  0x61   : > { %633 = vst [vmem:[%s1137_s25 + $0x198] sm:$0xff] %v505_v46  ;;  %634 = vst [vmem:[%s1137_s25 + $0x1a0] sm:$0xff] %v506_v47  ;;  %v509_v56 = vadd.f32 %v1108_v5, %v380_v49  ;;  %v384_v57 = vmul.f32 %v1103_v1, %v253_v43  ;;  %v385_v58 = vmul.f32 %v1103_v1, %v254_v44  ;;  %v274_v46 = vld [vmem:[%s1096_s11 + $0x280] sm:$0xff]  ;;  %v275_v47 = vld [vmem:[%s1096_s11 + $0x288] sm:$0xff] }
  0x62   : > { %635 = vst [vmem:[%s1137_s25 + $0x1a8] sm:$0xff] %v507_v48  ;;  %v386_v59 = vmul.f32 %v1103_v1, %v255_v45  ;;  %636 = vst [vmem:[%s1137_s25 + $0x1b0] sm:$0xff] %v508_v51  ;;  %v510_v63 = vadd.f32 %v1108_v5, %v381_v52  ;;  %v511_v0 = vadd.f32 %v1108_v5, %v382_v53  ;;  %v276_v48 = vld [vmem:[%s1096_s11 + $0x290] sm:$0xff]  ;;  %v277_v53 = vld [vmem:[%s1096_s11 + $0x298] sm:$0xff] }
  0x63   : > { %v512_v2 = vadd.f32 %v1108_v5, %v383_v54  ;;  %v387_v3 = vmul.f32 %v1103_v1, %v256_v50  ;;  %637 = vst [vmem:[%s1137_s25 + $0x1b8] sm:$0xff] %v509_v56  ;;  %v513_v8 = vadd.f32 %v1108_v5, %v384_v57  ;;  %v514_v9 = vadd.f32 %v1108_v5, %v385_v58  ;;  %v278_v54 = vld [vmem:[%s1096_s11 + $0x2a0] sm:$0xff] }
  0x64   : > { %v515_v10 = vadd.f32 %v1108_v5, %v386_v59  ;;  %v388_v11 = vmul.f32 %v1103_v1, %v257_v55  ;;  %638 = vst [vmem:[%s1137_s25 + $0x1c0] sm:$0xff] %v510_v63  ;;  %639 = vst [vmem:[%s1137_s25 + $0x1c8] sm:$0xff] %v511_v0  ;;  %v389_v14 = vmul.f32 %v1103_v1, %v258_v60  ;;  %v279_v55 = vld [vmem:[%s1096_s11 + $0x2a8] sm:$0xff]  ;;  %v280_v60 = vld [vmem:[%s1096_s11 + $0x2b0] sm:$0xff] }
  0x65   : > { %640 = vst [vmem:[%s1137_s25 + $0x1d0] sm:$0xff] %v512_v2  ;;  %v516_v13 = vadd.f32 %v1108_v5, %v387_v3  ;;  %v390_v15 = vmul.f32 %v1103_v1, %v259_v61  ;;  %v391_v16 = vmul.f32 %v1103_v1, %v260_v62  ;;  %641 = vst [vmem:[%s1137_s25 + $0x1d8] sm:$0xff] %v513_v8  ;;  %v281_v2 = vld [vmem:[%s1096_s11 + $0x2b8] sm:$0xff]  ;;  %v282_v8 = vld [vmem:[%s1096_s11 + $0x2c0] sm:$0xff] }
  0x66   : > { %642 = vst [vmem:[%s1137_s25 + $0x1e0] sm:$0xff] %v514_v9  ;;  %643 = vst [vmem:[%s1137_s25 + $0x1e8] sm:$0xff] %v515_v10  ;;  %v517_v18 = vadd.f32 %v1108_v5, %v388_v11  ;;  %v392_v19 = vmul.f32 %v1103_v1, %v261_v4  ;;  %v393_v20 = vmul.f32 %v1103_v1, %v262_v6  ;;  %v283_v9 = vld [vmem:[%s1096_s11 + $0x2c8] sm:$0xff]  ;;  %v284_v10 = vld [vmem:[%s1096_s11 + $0x2d0] sm:$0xff] }
  0x67   : > { %v394_v21 = vmul.f32 %v1103_v1, %v263_v7  ;;  %644 = vst [vmem:[%s1137_s25 + $0x1f0] sm:$0xff] %v516_v13  ;;  %v518_v25 = vadd.f32 %v1108_v5, %v389_v14  ;;  %v519_v26 = vadd.f32 %v1108_v5, %v390_v15  ;;  %v520_v27 = vadd.f32 %v1108_v5, %v391_v16  ;;  %v285_v15 = vld [vmem:[%s1096_s11 + $0x2d8] sm:$0xff]  ;;  %v286_v16 = vld [vmem:[%s1096_s11 + $0x2e0] sm:$0xff] }
  0x68   : > { %v395_v28 = vmul.f32 %v1103_v1, %v264_v12  ;;  %645 = vst [vmem:[%s1137_s25 + $0x1f8] sm:$0xff] %v517_v18  ;;  %v521_v32 = vadd.f32 %v1108_v5, %v392_v19  ;;  %v522_v33 = vadd.f32 %v1108_v5, %v393_v20  ;;  %v396_v35 = vmul.f32 %v1103_v1, %v265_v17  ;;  %v287_v17 = vld [vmem:[%s1096_s11 + $0x2e8] sm:$0xff] }
  0x69   : > { %v523_v34 = vadd.f32 %v1108_v5, %v394_v21  ;;  %646 = vst [vmem:[%s1137_s25 + $0x200] sm:$0xff] %v518_v25  ;;  %647 = vst [vmem:[%s1137_s25 + $0x208] sm:$0xff] %v519_v26  ;;  %v397_v38 = vmul.f32 %v1103_v1, %v266_v22  ;;  %v398_v39 = vmul.f32 %v1103_v1, %v267_v23  ;;  %v288_v22 = vld [vmem:[%s1096_s11 + $0x2f0] sm:$0xff] }
  0x6a   : > { %648 = vst [vmem:[%s1137_s25 + $0x210] sm:$0xff] %v520_v27  ;;  %v524_v37 = vadd.f32 %v1108_v5, %v395_v28  ;;  %v399_v40 = vmul.f32 %v1103_v1, %v268_v24  ;;  %649 = vst [vmem:[%s1137_s25 + $0x218] sm:$0xff] %v521_v32  ;;  %v525_v42 = vadd.f32 %v1108_v5, %v396_v35  ;;  %v289_v27 = vld [vmem:[%s1096_s11 + $0x2f8] sm:$0xff]  ;;  %v290_v32 = vld [vmem:[%s1096_s11 + $0x300] sm:$0xff] }
  0x6b   : > { %650 = vst [vmem:[%s1137_s25 + $0x220] sm:$0xff] %v522_v33  ;;  %651 = vst [vmem:[%s1137_s25 + $0x228] sm:$0xff] %v523_v34  ;;  %v400_v43 = vmul.f32 %v1103_v1, %v269_v29  ;;  %v401_v44 = vmul.f32 %v1103_v1, %v270_v30  ;;  %v402_v45 = vmul.f32 %v1103_v1, %v271_v31  ;;  %v291_v33 = vld [vmem:[%s1096_s11 + $0x308] sm:$0xff]  ;;  %v292_v34 = vld [vmem:[%s1096_s11 + $0x310] sm:$0xff] }
  0x6c   : > { %652 = vst [vmem:[%s1137_s25 + $0x230] sm:$0xff] %v524_v37  ;;  %v526_v49 = vadd.f32 %v1108_v5, %v397_v38  ;;  %v527_v50 = vadd.f32 %v1108_v5, %v398_v39  ;;  %v528_v51 = vadd.f32 %v1108_v5, %v399_v40  ;;  %v403_v52 = vmul.f32 %v1103_v1, %v272_v36  ;;  %v293_v39 = vld [vmem:[%s1096_s11 + $0x318] sm:$0xff]  ;;  %v294_v40 = vld [vmem:[%s1096_s11 + $0x320] sm:$0xff] }
  0x6d   : > { %653 = vst [vmem:[%s1137_s25 + $0x238] sm:$0xff] %v525_v42  ;;  %v529_v56 = vadd.f32 %v1108_v5, %v400_v43  ;;  %v530_v57 = vadd.f32 %v1108_v5, %v401_v44  ;;  %v531_v58 = vadd.f32 %v1108_v5, %v402_v45  ;;  %v404_v59 = vmul.f32 %v1103_v1, %v273_v41  ;;  %v295_v41 = vld [vmem:[%s1096_s11 + $0x328] sm:$0xff] }
  0x6e   : > { %654 = vst [vmem:[%s1137_s25 + $0x240] sm:$0xff] %v526_v49  ;;  %655 = vst [vmem:[%s1137_s25 + $0x248] sm:$0xff] %v527_v50  ;;  %v532_v61 = vadd.f32 %v1108_v5, %v403_v52  ;;  %v405_v62 = vmul.f32 %v1103_v1, %v274_v46  ;;  %v406_v63 = vmul.f32 %v1103_v1, %v275_v47  ;;  %v296_v46 = vld [vmem:[%s1096_s11 + $0x330] sm:$0xff] }
  0x6f   : > { %656 = vst [vmem:[%s1137_s25 + $0x250] sm:$0xff] %v528_v51  ;;  %v407_v0 = vmul.f32 %v1103_v1, %v276_v48  ;;  %657 = vst [vmem:[%s1137_s25 + $0x258] sm:$0xff] %v529_v56  ;;  %v533_v3 = vadd.f32 %v1108_v5, %v404_v59  ;;  %v408_v4 = vmul.f32 %v1103_v1, %v277_v53  ;;  %v297_v51 = vld [vmem:[%s1096_s11 + $0x338] sm:$0xff]  ;;  %v298_v56 = vld [vmem:[%s1096_s11 + $0x340] sm:$0xff] }
  0x70   : > { %658 = vst [vmem:[%s1137_s25 + $0x260] sm:$0xff] %v530_v57  ;;  %659 = vst [vmem:[%s1137_s25 + $0x268] sm:$0xff] %v531_v58  ;;  %v409_v6 = vmul.f32 %v1103_v1, %v278_v54  ;;  %v410_v7 = vmul.f32 %v1103_v1, %v279_v55  ;;  %v534_v11 = vadd.f32 %v1108_v5, %v405_v62  ;;  %v299_v57 = vld [vmem:[%s1096_s11 + $0x348] sm:$0xff]  ;;  %v300_v58 = vld [vmem:[%s1096_s11 + $0x350] sm:$0xff] }
  0x71   : > { %660 = vst [vmem:[%s1137_s25 + $0x270] sm:$0xff] %v532_v61  ;;  %v535_v12 = vadd.f32 %v1108_v5, %v406_v63  ;;  %v536_v13 = vadd.f32 %v1108_v5, %v407_v0  ;;  %v411_v14 = vmul.f32 %v1103_v1, %v280_v60  ;;  %661 = vst [vmem:[%s1137_s25 + $0x278] sm:$0xff] %v533_v3  ;;  %v301_v63 = vld [vmem:[%s1096_s11 + $0x358] sm:$0xff]  ;;  %v302_v0 = vld [vmem:[%s1096_s11 + $0x360] sm:$0xff] }
  0x72   : > { %v537_v18 = vadd.f32 %v1108_v5, %v408_v4  ;;  %v538_v19 = vadd.f32 %v1108_v5, %v409_v6  ;;  %v539_v20 = vadd.f32 %v1108_v5, %v410_v7  ;;  %v412_v21 = vmul.f32 %v1103_v1, %v281_v2  ;;  %662 = vst [vmem:[%s1137_s25 + $0x280] sm:$0xff] %v534_v11  ;;  %v303_v2 = vld [vmem:[%s1096_s11 + $0x368] sm:$0xff] }
  0x73   : > { %663 = vst [vmem:[%s1137_s25 + $0x288] sm:$0xff] %v535_v12  ;;  %664 = vst [vmem:[%s1137_s25 + $0x290] sm:$0xff] %v536_v13  ;;  %v540_v23 = vadd.f32 %v1108_v5, %v411_v14  ;;  %v413_v24 = vmul.f32 %v1103_v1, %v282_v8  ;;  %v414_v25 = vmul.f32 %v1103_v1, %v283_v9  ;;  %v304_v8 = vld [vmem:[%s1096_s11 + $0x370] sm:$0xff]  ;;  %v305_v13 = vld [vmem:[%s1096_s11 + $0x378] sm:$0xff] }
  0x74   : > { %v415_v26 = vmul.f32 %v1103_v1, %v284_v10  ;;  %665 = vst [vmem:[%s1137_s25 + $0x298] sm:$0xff] %v537_v18  ;;  %666 = vst [vmem:[%s1137_s25 + $0x2a0] sm:$0xff] %v538_v19  ;;  %v541_v28 = vadd.f32 %v1108_v5, %v412_v21  ;;  %v416_v29 = vmul.f32 %v1103_v1, %v285_v15  ;;  %v306_v18 = vld [vmem:[%s1096_s11 + $0x380] sm:$0xff]  ;;  %v307_v19 = vld [vmem:[%s1096_s11 + $0x388] sm:$0xff] }
  0x75   : > { %667 = vst [vmem:[%s1137_s25 + $0x2a8] sm:$0xff] %v539_v20  ;;  %v417_v30 = vmul.f32 %v1103_v1, %v286_v16  ;;  %v418_v31 = vmul.f32 %v1103_v1, %v287_v17  ;;  %668 = vst [vmem:[%s1137_s25 + $0x2b0] sm:$0xff] %v540_v23  ;;  %v542_v35 = vadd.f32 %v1108_v5, %v413_v24  ;;  %v308_v20 = vld [vmem:[%s1096_s11 + $0x390] sm:$0xff] }
  0x76   : > { %v543_v36 = vadd.f32 %v1108_v5, %v414_v25  ;;  %v544_v37 = vadd.f32 %v1108_v5, %v415_v26  ;;  %v419_v38 = vmul.f32 %v1103_v1, %v288_v22  ;;  %669 = vst [vmem:[%s1137_s25 + $0x2b8] sm:$0xff] %v541_v28  ;;  %v545_v42 = vadd.f32 %v1108_v5, %v416_v29  ;;  %v309_v25 = vld [vmem:[%s1096_s11 + $0x398] sm:$0xff]  ;;  %v310_v26 = vld [vmem:[%s1096_s11 + $0x3a0] sm:$0xff] }
  0x77   : > { %v546_v43 = vadd.f32 %v1108_v5, %v417_v30  ;;  %v547_v44 = vadd.f32 %v1108_v5, %v418_v31  ;;  %v420_v45 = vmul.f32 %v1103_v1, %v289_v27  ;;  %670 = vst [vmem:[%s1137_s25 + $0x2c0] sm:$0xff] %v542_v35  ;;  %v421_v48 = vmul.f32 %v1103_v1, %v290_v32  ;;  %v311_v27 = vld [vmem:[%s1096_s11 + $0x3a8] sm:$0xff]  ;;  %v312_v32 = vld [vmem:[%s1096_s11 + $0x3b0] sm:$0xff] }
  0x78   : > { %671 = vst [vmem:[%s1137_s25 + $0x2c8] sm:$0xff] %v543_v36  ;;  %672 = vst [vmem:[%s1137_s25 + $0x2d0] sm:$0xff] %v544_v37  ;;  %v548_v47 = vadd.f32 %v1108_v5, %v419_v38  ;;  %v422_v49 = vmul.f32 %v1103_v1, %v291_v33  ;;  %v423_v50 = vmul.f32 %v1103_v1, %v292_v34  ;;  %v313_v37 = vld [vmem:[%s1096_s11 + $0x3b8] sm:$0xff] }
  0x79   : > { %673 = vst [vmem:[%s1137_s25 + $0x2d8] sm:$0xff] %v545_v42  ;;  %674 = vst [vmem:[%s1137_s25 + $0x2e0] sm:$0xff] %v546_v43  ;;  %v549_v52 = vadd.f32 %v1108_v5, %v420_v45  ;;  %v424_v53 = vmul.f32 %v1103_v1, %v293_v39  ;;  %v425_v54 = vmul.f32 %v1103_v1, %v294_v40  ;;  %v314_v42 = vld [vmem:[%s1096_s11 + $0x3c0] sm:$0xff]  ;;  %v315_v43 = vld [vmem:[%s1096_s11 + $0x3c8] sm:$0xff] }
  0x7a   : > { %675 = vst [vmem:[%s1137_s25 + $0x2e8] sm:$0xff] %v547_v44  ;;  %v426_v55 = vmul.f32 %v1103_v1, %v295_v41  ;;  %676 = vst [vmem:[%s1137_s25 + $0x2f0] sm:$0xff] %v548_v47  ;;  %v550_v59 = vadd.f32 %v1108_v5, %v421_v48  ;;  %v551_v60 = vadd.f32 %v1108_v5, %v422_v49  ;;  %v316_v44 = vld [vmem:[%s1096_s11 + $0x3d0] sm:$0xff]  ;;  %v317_v49 = vld [vmem:[%s1096_s11 + $0x3d8] sm:$0xff] }
  0x7b   : > { %v552_v61 = vadd.f32 %v1108_v5, %v423_v50  ;;  %v427_v62 = vmul.f32 %v1103_v1, %v296_v46  ;;  %677 = vst [vmem:[%s1137_s25 + $0x2f8] sm:$0xff] %v549_v52  ;;  %v553_v3 = vadd.f32 %v1108_v5, %v424_v53  ;;  %v554_v4 = vadd.f32 %v1108_v5, %v425_v54  ;;  %v318_v50 = vld [vmem:[%s1096_s11 + $0x3e0] sm:$0xff] }
  0x7c   : > { %v555_v6 = vadd.f32 %v1108_v5, %v426_v55  ;;  %v428_v7 = vmul.f32 %v1103_v1, %v297_v51  ;;  %678 = vst [vmem:[%s1137_s25 + $0x300] sm:$0xff] %v550_v59  ;;  %679 = vst [vmem:[%s1137_s25 + $0x308] sm:$0xff] %v551_v60  ;;  %v429_v10 = vmul.f32 %v1103_v1, %v298_v56  ;;  %v319_v51 = vld [vmem:[%s1096_s11 + $0x3e8] sm:$0xff]  ;;  %v320_v56 = vld [vmem:[%s1096_s11 + $0x3f0] sm:$0xff] }
  0x7d   : > { %680 = vst [vmem:[%s1137_s25 + $0x310] sm:$0xff] %v552_v61  ;;  %v556_v9 = vadd.f32 %v1108_v5, %v427_v62  ;;  %v430_v11 = vmul.f32 %v1103_v1, %v299_v57  ;;  %v431_v12 = vmul.f32 %v1103_v1, %v300_v58  ;;  %681 = vst [vmem:[%s1137_s25 + $0x318] sm:$0xff] %v553_v3  ;;  %v321_v61 = vld [vmem:[%s1096_s11 + $0x3f8] sm:$0xff] }
  0x7e   : > { %682 = vst [vmem:[%s1137_s25 + $0x320] sm:$0xff] %v554_v4  ;;  %683 = vst [vmem:[%s1137_s25 + $0x328] sm:$0xff] %v555_v6  ;;  %v557_v14 = vadd.f32 %v1108_v5, %v428_v7  ;;  %v432_v15 = vmul.f32 %v1103_v1, %v301_v63  ;;  %v433_v16 = vmul.f32 %v1103_v1, %v302_v0 }
  0x7f   : > { %v434_v17 = vmul.f32 %v1103_v1, %v303_v2  ;;  %684 = vst [vmem:[%s1137_s25 + $0x330] sm:$0xff] %v556_v9  ;;  %v558_v21 = vadd.f32 %v1108_v5, %v429_v10  ;;  %v559_v22 = vadd.f32 %v1108_v5, %v430_v11  ;;  %v560_v23 = vadd.f32 %v1108_v5, %v431_v12 }
  0x80   : > { %v435_v24 = vmul.f32 %v1103_v1, %v304_v8  ;;  %685 = vst [vmem:[%s1137_s25 + $0x338] sm:$0xff] %v557_v14  ;;  %v561_v28 = vadd.f32 %v1108_v5, %v432_v15  ;;  %v562_v29 = vadd.f32 %v1108_v5, %v433_v16  ;;  %v436_v31 = vmul.f32 %v1103_v1, %v305_v13 }
  0x81   : > { %v563_v30 = vadd.f32 %v1108_v5, %v434_v17  ;;  %686 = vst [vmem:[%s1137_s25 + $0x340] sm:$0xff] %v558_v21  ;;  %687 = vst [vmem:[%s1137_s25 + $0x348] sm:$0xff] %v559_v22  ;;  %v437_v34 = vmul.f32 %v1103_v1, %v306_v18  ;;  %v438_v35 = vmul.f32 %v1103_v1, %v307_v19 }
  0x82   : > { %688 = vst [vmem:[%s1137_s25 + $0x350] sm:$0xff] %v560_v23  ;;  %v564_v33 = vadd.f32 %v1108_v5, %v435_v24  ;;  %v439_v36 = vmul.f32 %v1103_v1, %v308_v20  ;;  %689 = vst [vmem:[%s1137_s25 + $0x358] sm:$0xff] %v561_v28  ;;  %v565_v38 = vadd.f32 %v1108_v5, %v436_v31 }
  0x83   : > { %690 = vst [vmem:[%s1137_s25 + $0x360] sm:$0xff] %v562_v29  ;;  %691 = vst [vmem:[%s1137_s25 + $0x368] sm:$0xff] %v563_v30  ;;  %v440_v39 = vmul.f32 %v1103_v1, %v309_v25  ;;  %v441_v40 = vmul.f32 %v1103_v1, %v310_v26  ;;  %v442_v41 = vmul.f32 %v1103_v1, %v311_v27 }
  0x84   : > { %692 = vst [vmem:[%s1137_s25 + $0x370] sm:$0xff] %v564_v33  ;;  %v566_v45 = vadd.f32 %v1108_v5, %v437_v34  ;;  %v567_v46 = vadd.f32 %v1108_v5, %v438_v35  ;;  %v568_v47 = vadd.f32 %v1108_v5, %v439_v36  ;;  %v443_v48 = vmul.f32 %v1103_v1, %v312_v32 }
  0x85   : > { %693 = vst [vmem:[%s1137_s25 + $0x378] sm:$0xff] %v565_v38  ;;  %v569_v52 = vadd.f32 %v1108_v5, %v440_v39  ;;  %v570_v53 = vadd.f32 %v1108_v5, %v441_v40  ;;  %v571_v54 = vadd.f32 %v1108_v5, %v442_v41  ;;  %v444_v55 = vmul.f32 %v1103_v1, %v313_v37 }
  0x86   : > { %694 = vst [vmem:[%s1137_s25 + $0x380] sm:$0xff] %v566_v45  ;;  %695 = vst [vmem:[%s1137_s25 + $0x388] sm:$0xff] %v567_v46  ;;  %v572_v57 = vadd.f32 %v1108_v5, %v443_v48  ;;  %v445_v58 = vmul.f32 %v1103_v1, %v314_v42  ;;  %v446_v59 = vmul.f32 %v1103_v1, %v315_v43 }
  0x87   : > { %696 = vst [vmem:[%s1137_s25 + $0x390] sm:$0xff] %v568_v47  ;;  %v447_v60 = vmul.f32 %v1103_v1, %v316_v44  ;;  %697 = vst [vmem:[%s1137_s25 + $0x398] sm:$0xff] %v569_v52  ;;  %v573_v62 = vadd.f32 %v1108_v5, %v444_v55  ;;  %v448_v63 = vmul.f32 %v1103_v1, %v317_v49 }
  0x88   : > { %698 = vst [vmem:[%s1137_s25 + $0x3a0] sm:$0xff] %v570_v53  ;;  %699 = vst [vmem:[%s1137_s25 + $0x3a8] sm:$0xff] %v571_v54  ;;  %v449_v0 = vmul.f32 %v1103_v1, %v318_v50  ;;  %v450_v2 = vmul.f32 %v1103_v1, %v319_v51  ;;  %v574_v3 = vadd.f32 %v1108_v5, %v445_v58 }
  0x89   : > { %700 = vst [vmem:[%s1137_s25 + $0x3b0] sm:$0xff] %v572_v57  ;;  %v575_v4 = vadd.f32 %v1108_v5, %v446_v59  ;;  %v576_v6 = vadd.f32 %v1108_v5, %v447_v60  ;;  %v451_v7 = vmul.f32 %v1103_v1, %v320_v56  ;;  %701 = vst [vmem:[%s1137_s25 + $0x3b8] sm:$0xff] %v573_v62 }
  0x8a   : > { %v577_v8 = vadd.f32 %v1108_v5, %v448_v63  ;;  %v578_v9 = vadd.f32 %v1108_v5, %v449_v0  ;;  %v579_v10 = vadd.f32 %v1108_v5, %v450_v2  ;;  %v452_v11 = vmul.f32 %v1103_v1, %v321_v61  ;;  %702 = vst [vmem:[%s1137_s25 + $0x3c0] sm:$0xff] %v574_v3 }
  0x8b   : > { %703 = vst [vmem:[%s1137_s25 + $0x3c8] sm:$0xff] %v575_v4  ;;  %704 = vst [vmem:[%s1137_s25 + $0x3d0] sm:$0xff] %v576_v6  ;;  %v580_v12 = vadd.f32 %v1108_v5, %v451_v7 }
  0x8c   : > { %705 = vst [vmem:[%s1137_s25 + $0x3d8] sm:$0xff] %v577_v8  ;;  %706 = vst [vmem:[%s1137_s25 + $0x3e0] sm:$0xff] %v578_v9  ;;  %v581_v13 = vadd.f32 %v1108_v5, %v452_v11 }
  0x8d   : > { %707 = vst [vmem:[%s1137_s25 + $0x3e8] sm:$0xff] %v579_v10  ;;  %708 = vst [vmem:[%s1137_s25 + $0x3f0] sm:$0xff] %v580_v12 }
  0x8e   : > { %709 = vst [vmem:[%s1137_s25 + $0x3f8] sm:$0xff] %v581_v13 }
  0x8f   : > { %909 = shalt.err (!%p906_p9)
}
  0x90   : > { %s910_s24 = scalar_lea.hbm %s1621_s13, 16384  ;;  %s914_s30 = scalar_lea.hbm %s1674_s3, 65536 }
  0x91   : > { %p911_p13 = scmp.ne.s32.totalorder %s1621_s13, %s910_s24  ;;  %p915_p2 = scmp.lt.s32.totalorder %s1621_s13, %s1674_s3 }
  0x92   : > { %p916_p3 = scmp.lt.s32.totalorder %s914_s30, %s910_s24 }
  0x93   : > { %p912_p1 = pnand %p911_p13, %p1683_p11 }
  0x94   : > { %p917_p6 = por %p916_p3, %p915_p2 }
  0x95   : > { %p913_p0 = pneg %p912_p1 }
  0x97   : > { %p918_p10 = pnand %p917_p6, %p913_p0 }
  0x99   : > { %921 = shalt.err (!%p918_p10)
}
  0x9a   : > { %s966_s11 = smov 256   ;;  %s967_s6 = smov 16  }
  0x9b   : > { %820 = dma.vmem_to_hbm [thread:$0]  (%p1683_p11), %s1627_s10, 16384, %s1621_s13, %s711_s14, %s966_s11, %s966_s11, %s967_s6  }
  0x9c PF: > { %p831_p12 = scmp.ge.s32.totalorder %s960_s19, 2  ;;  %s740_s8 = sand.u32 1, %s948_s16  }
  0x9d   : > { %p1684_p4 = scmp.ne.s32.totalorder %s1680_s27, 0  ;;  %s741_s25 = scalar_lea.sflag [#allocation6], %s740_s8 }
  0x9f   : > { %p827_p5 = pnand %p831_p12, %p1684_p4 }
  0xa1   : > { %p828_p7 = pneg %p827_p5 }
  0xa3   : > { %943 = dma.done.wait (%p828_p7), %s741_s25, 16384  }
  0xa4   : > { %945 = vsyncadd (%p828_p7), %s741_s25, 4294950912  ;;  %p18_p8 = scmp.ge.s32.totalorder %s1019_s20, 6   ;;  %s1685_s16 = smov %s952_s17 }
  0xa5   : > { %s1686_s17 = smov %s956_s18  ;;  %s1687_s18 = smov %s1031_s23 }
  0xa6   : > { %s1688_s19 = smov %s1019_s20  ;;  %20 = sbr.rel (!%p18_p8) target bundleno = 8 (0x8), region = 77 }
  0xab   :  { %746 = vsyncpa [#allocation5], 1 }
  0xac   :  { %748 = vsyncpa [#allocation5 + $0x1], 1 }
  0xad   :  { %749 = vsyncpa [#allocation6], 1 }
  0xae   :  { %751 = vsyncpa [#allocation6 + $0x1], 1 }

</bundles_post_ra>
